<compile_context>
chip_gen: v5e
topology: v5e:2x2
jax: 0.10.0
libtpu: 0.0.40
codegen_flags: <defaults>
</compile_context>

<pallas_src>
import functools
import re

import jax
import jax.numpy as jnp
from jax.experimental import pallas as pl
from jax.experimental.pallas import tpu as pltpu


# ----------------------------------------------------------------------------
# Generation-dependent tuning constants
# ----------------------------------------------------------------------------
def _tpu_generation():
    """Best-effort TPU generation (5, 6, 7, ...); 0 if unknown."""
    try:
        kind = jax.devices()[0].device_kind.lower()
    except Exception:
        return 0
    m = re.search(r"(\d+)", kind)
    return int(m.group(1)) if m else 0


_GEN = _tpu_generation()

if _GEN >= 7 or _GEN == 0:
    # v7x: 64 MiB physical VMEM. 8 MiB blocks -> in+out x 2 buffers = 32 MiB.
    _MAX_BLOCK_BYTES = 8 * 1024 * 1024
    _VMEM_LIMIT_BYTES = 48 * 1024 * 1024
else:
    # v4/v5e/v6e: 128 MiB physical VMEM -> bigger blocks, fewer grid steps.
    _MAX_BLOCK_BYTES = 16 * 1024 * 1024
    _VMEM_LIMIT_BYTES = 80 * 1024 * 1024

# Lane widths to try (largest first) -- all multiples of 128 so stores stay
# full-width unmasked vst.
_LANE_CANDIDATES = (2048, 1024, 512, 256, 128)


def _compute_dtype_for(dtype):
    """bf16 stays native on v6e/v7x (bf16 VPU); otherwise compute in f32."""
    if dtype == jnp.bfloat16 and _GEN >= 6:
        return jnp.bfloat16
    return jnp.float32


# ----------------------------------------------------------------------------
# Kernel
# ----------------------------------------------------------------------------
def _h_swish_kernel(x_ref, o_ref, *, compute_dtype):
    x = x_ref[...].astype(compute_dtype)
    # h_sigmoid(x) = relu6(x + 3) / 6 ; h_swish(x) = x * h_sigmoid(x)
    hsig = jnp.clip(x + 3.0, 0.0, 6.0) * (1.0 / 6.0)
    o_ref[...] = (x * hsig).astype(o_ref.dtype)


# ----------------------------------------------------------------------------
# Layout / tiling selection
# ----------------------------------------------------------------------------
def _choose_lanes(n):
    for cand in _LANE_CANDIDATES:
        if n % cand == 0:
            return cand
    return None


def _pick_tile_rows(rows, lanes, itemsize):
    """Rows per block: respect the VMEM block cap, but keep >= ~8 grid steps
    so the pipeline overlaps in/out DMA and both v7x TensorCores get work."""
    max_rows = _MAX_BLOCK_BYTES // (lanes * itemsize)
    max_rows = max(32, (max_rows // 32) * 32)  # multiple of 32: sub-32-bit packing
    if rows <= 32:
        return rows                      # tiny array: single full-height block
    target = -(-rows // 8)               # cdiv(rows, 8): aim for ~8 grid steps
    target = ((target + 31) // 32) * 32  # keep sublane tiling clean
    tile = min(target, max_rows)
    if tile >= rows:
        return rows                      # full-dim block is always legal
    return tile


def _run_2d(x2d, rows, lanes, tile_rows, out_dtype):
    n = rows * lanes
    itemsize = jnp.dtype(out_dtype).itemsize
    kernel = functools.partial(
        _h_swish_kernel, compute_dtype=_compute_dtype_for(out_dtype))
    return pl.pallas_call(
        kernel,
        out_shape=jax.ShapeDtypeStruct((rows, lanes), out_dtype),
        grid=(pl.cdiv(rows, tile_rows),),
        in_specs=[pl.BlockSpec((tile_rows, lanes), lambda i: (i, 0))],
        out_specs=pl.BlockSpec((tile_rows, lanes), lambda i: (i, 0)),
        # Shape/dtype preserving: callers that donate the activation reuse the
        # input HBM buffer (no extra allocation around the call).
        input_output_aliases={0: 0},
        compiler_params=pltpu.CompilerParams(
            # Single axis marked parallel -> shardable across v7x's 2 TCs.
            dimension_semantics=("parallel",),
            vmem_limit_bytes=_VMEM_LIMIT_BYTES,
        ),
        cost_estimate=pl.CostEstimate(
            flops=5 * n,
            transcendentals=0,
            bytes_accessed=2 * n * itemsize,
        ),
    )(x2d)


def _h_swish_jnp(x):
    """Plain-jnp fallback (used only for <128-element ragged tails)."""
    return x * (jnp.clip(x + 3.0, 0.0, 6.0) / 6.0)


# ----------------------------------------------------------------------------
# Public entry point
# ----------------------------------------------------------------------------
def h_swish(x):
    """Elementwise h_swish on an arbitrarily-shaped array (NCHW expected)."""
    orig_shape = x.shape
    dtype = x.dtype
    n = x.size
    if n == 0:
        return x
    itemsize = jnp.dtype(dtype).itemsize

    lanes = _choose_lanes(n)
    if lanes is not None:
        # Common case (conv activations): cheap reshape, no padding copies.
        rows = n // lanes
        tile_rows = _pick_tile_rows(rows, lanes, itemsize)
        out2d = _run_2d(jnp.reshape(x, (rows, lanes)), rows, lanes, tile_rows, dtype)
        return jnp.reshape(out2d, orig_shape)

    # Ragged case (n not a multiple of 128): kernel on the aligned flat
    # prefix, plain jnp on the <128-element tail.  No full-array pad / slice.
    xf = jnp.reshape(x, (-1,))
    m = (n // 128) * 128
    if m == 0:
        return jnp.reshape(_h_swish_jnp(xf), orig_shape).astype(dtype)
    head = xf[:m]
    tail = xf[m:]
    lanes = _choose_lanes(m)
    rows = m // lanes
    tile_rows = _pick_tile_rows(rows, lanes, itemsize)
    head_out = _run_2d(jnp.reshape(head, (rows, lanes)), rows, lanes, tile_rows, dtype)
    out_flat = jnp.concatenate(
        [jnp.reshape(head_out, (-1,)), _h_swish_jnp(tail).astype(dtype)])
    return jnp.reshape(out_flat, orig_shape)


def h_swish_ref(x):
    return x * (jnp.clip(x + 3.0, 0.0, 6.0) / 6.0)


if __name__ == "__main__":
    key = jax.random.PRNGKey(0)
    # NCHW input, consistent with PyTorch conv conventions.
    x = jax.random.normal(key, (2, 4, 16, 16), dtype=jnp.float32) * 4.0

    y = jax.block_until_ready(h_swish(x))
    y_ref = h_swish_ref(x)
    assert y.shape == x.shape and y.dtype == x.dtype
    assert jnp.allclose(y, y_ref, atol=1e-6, rtol=1e-6)

    # bf16 path (native bf16 compute on v6e/v7x, f32 upcast on older gens).
    xb = x.astype(jnp.bfloat16)
    yb = jax.block_until_ready(h_swish(xb))
    assert yb.shape == xb.shape and yb.dtype == jnp.bfloat16
    assert jnp.allclose(yb.astype(jnp.float32),
                        h_swish_ref(xb.astype(jnp.float32)),
                        atol=0.05, rtol=0.1)

    # Ragged path: 3*5*9 = 135 elements -> kernel on 128-elem prefix + jnp tail.
    x2 = jax.random.normal(jax.random.PRNGKey(1), (3, 5, 9), dtype=jnp.float32) * 4.0
    y2 = jax.block_until_ready(h_swish(x2))
    assert y2.shape == x2.shape and y2.dtype == x2.dtype
    assert jnp.allclose(y2, h_swish_ref(x2), atol=1e-6, rtol=1e-6)

    print("KERNEL_OK")
</pallas_src>

<mosaic_0001>
module attributes {stable_mosaic.version = 11 : i64} {
  func.func @_h_swish_kernel(%arg0: i32, %arg1: memref<1x2048xf32, #tpu.memory_space<vmem>>, %arg2: memref<1x2048xf32, #tpu.memory_space<vmem>>) attributes {dimension_semantics = [#tpu.dimension_semantics<parallel>], iteration_bounds = array<i64: 1>, scalar_prefetch = 0 : i64, scratch_operands = 0 : i64, tpu.core_type = #tpu.core_type<tc>, window_params = [{transform_indices = @transform_0, window_bounds = array<i64: 1, 2048>}, {transform_indices = @transform_1, window_bounds = array<i64: 1, 2048>}]} {
    %c0 = arith.constant 0 : index
    %c0_0 = arith.constant 0 : index
    %0 = vector.load %arg1[%c0, %c0_0] : memref<1x2048xf32, #tpu.memory_space<vmem>>, vector<1x2048xf32>
    %cst = arith.constant 3.000000e+00 : f32
    %1 = vector.broadcast %cst : f32 to vector<1x2048xf32>
    %2 = arith.addf %0, %1 : vector<1x2048xf32>
    %cst_1 = arith.constant 0.000000e+00 : f32
    %cst_2 = arith.constant 6.000000e+00 : f32
    %3 = vector.broadcast %cst_1 : f32 to vector<1x2048xf32>
    %4 = arith.maximumf %3, %2 : vector<1x2048xf32>
    %5 = vector.broadcast %cst_2 : f32 to vector<1x2048xf32>
    %6 = arith.minimumf %5, %4 : vector<1x2048xf32>
    %cst_3 = arith.constant 0.166666672 : f32
    %7 = vector.broadcast %cst_3 : f32 to vector<1x2048xf32>
    %8 = arith.mulf %6, %7 : vector<1x2048xf32>
    %9 = arith.mulf %0, %8 : vector<1x2048xf32>
    %c0_4 = arith.constant 0 : index
    %c0_5 = arith.constant 0 : index
    %10 = vector.load %arg2[%c0_4, %c0_5] : memref<1x2048xf32, #tpu.memory_space<vmem>>, vector<1x2048xf32>
    tpu.vector_store %arg2[%c0_4, %c0_5], %9 {strides = array<i32>} : memref<1x2048xf32, #tpu.memory_space<vmem>>, vector<1x2048xf32>,
    return
  }
  func.func @transform_0(%arg0: i32) -> (i32, i32) {
    %c0_i32 = arith.constant 0 : i32
    %c0_i32_0 = arith.constant 0 : i32
    return %arg0, %c0_i32 : i32, i32
  }
  func.func @transform_1(%arg0: i32) -> (i32, i32) {
    %c0_i32 = arith.constant 0 : i32
    %c0_i32_0 = arith.constant 0 : i32
    return %arg0, %c0_i32 : i32, i32
  }
}

</mosaic_0001>

<bundles_post_ra>
// kernel: tpu_custom_call.1
= control target key start
LH: loop header
LB: loop body
LE: loop exit
PB: predicated region body
PF: predicated region fallthrough
CT: control target
= control target key end

     0   :  { %6 = vsyncpa [#allocation3], 0  ;;  %s126_s0 = inlined_call_operand.hbm [shape: f32[1,2048], index: 0, kind: input, shape index: {}, may-alias: {0,1}]   ;;  %s127_s1 = inlined_call_operand.hbm [shape: f32[1,2048], index: 1, kind: output, shape index: {}, may-alias: {0,1}]  }
   0x1   :  { %7 = vsyncpa [#allocation4], 0  ;;  %s13_s8 = sshll.u32 %s126_s0, 4  ;;  %s108_s9 = smov [#allocation2]   ;;  %s14_s8 = int_to_ptr.hbm [resolvable:$true] %s13_s8 }
   0x2   :  { %s15_s10 = sshll.u32 %s108_s9, 4  ;;  %s16_s10 = int_to_ptr.vmem [resolvable:$true] %s15_s10 }
   0x3   :  { %18 = dma.hbm_to_vmem [thread:$0]  %s14_s8, 256, %s16_s10, [#allocation3]  }
   0x4   :  { %104 = dma.done.wait [#allocation3], 256  }
   0x5   :  { %105 = vsyncadd [#allocation3], 4294967040  ;;  %v23_v0 = vld [vmem:[#allocation2] sm:$0xff]  ;;  %v24_v1 = vld [vmem:[#allocation2 + $0x8] sm:$0xff]  ;;  %s109_s11 = smov [#allocation5]   ;;  %s44_s14 = sshll.u32 %s127_s1, 4  ;;  %s45_s14 = int_to_ptr.hbm [resolvable:$true] %s44_s14 }
   0x6   :  { %v25_v2 = vadd.f32 3.0, %v23_v0  ;;  %v26_v3 = vadd.f32 3.0, %v24_v1  ;;  %s42_s12 = sshll.u32 %s109_s11, 4  ;;  %s43_s12 = int_to_ptr.vmem [resolvable:$true] %s42_s12 }
   0x8   :  { %v27_v4 = vmax.f32 %v25_v2, 0.0  ;;  %v28_v5 = vmax.f32 %v26_v3, 0.0 }
   0xa   :  { %v29_v6 = vmin.f32 %v27_v4, 6.0  ;;  %v30_v7 = vmin.f32 %v28_v5, 6.0 }
   0xc   :  { %v31_v8 = vmul.f32 0.16666667, %v29_v6  ;;  %v32_v9 = vmul.f32 0.16666667, %v30_v7 }
   0xe   :  { %v33_v10 = vmul.f32 %v31_v8, %v23_v0  ;;  %v34_v11 = vmul.f32 %v32_v9, %v24_v1 }
  0x10   :  { %35 = vst [vmem:[#allocation5] sm:$0xff] %v33_v10 }
  0x11   :  { %36 = vst [vmem:[#allocation5 + $0x8] sm:$0xff] %v34_v11 }
  0x12   :  { %47 = dma.vmem_to_hbm [thread:$0]  %s43_s12, 256, %s45_s14, [#allocation4]  }
  0x13   :  { %106 = dma.done.wait [#allocation4], 256  }
  0x14   :  { %107 = vsyncadd [#allocation4], 4294967040 }
  0x15   :  { %52 = vsyncpa [#allocation3], 1 }
  0x16   :  { %53 = vsyncpa [#allocation4], 1 }

</bundles_post_ra>
